<compile_context>
chip_gen: v7x
topology: tpu7x:2x2x1
jax: 0.10.0
libtpu: 0.0.40
codegen_flags: <defaults>
</compile_context>

<pallas_src>
import functools

import jax
import jax.numpy as jnp
import numpy as np
from jax.experimental import pallas as pl
from jax.experimental.pallas import tpu as pltpu

_LANE = 128


# ----------------------------- pooling kernel --------------------------------

def _pool_kernel(x_ref, o_ref, sum_acc, max_acc, *, spatial_size, inv_hw):
    # x_ref:   (block_c, block_s)  one spatial tile of one channel block (NCHW order)
    # o_ref:   (block_c, 2)        column 0 = mean, column 1 = max (f32)
    # sum_acc/max_acc: (block_c, acc_w) f32 accumulators, persist across s tiles
    s_id = pl.program_id(2)

    @pl.when(s_id == 0)
    def _init():
        sum_acc[...] = jnp.zeros_like(sum_acc)
        max_acc[...] = jnp.full_like(max_acc, -jnp.inf)

    block_c, block_s = x_ref.shape
    acc_w = sum_acc.shape[1]
    num_chunks = block_s // acc_w
    ragged = (spatial_size % block_s) != 0      # static: only mask when needed

    # Pure VPU accumulation over lane-aligned chunks; the single cross-lane
    # collapse (XLU) happens once per (n, c) block in the finalize step below.
    # f32 accumulation keeps correctness on all generations (v5e has no bf16 VALU).
    psum = sum_acc[...]
    pmax = max_acc[...]
    base = s_id * block_s
    for i in range(num_chunks):
        lo = i * acc_w
        chunk = x_ref[:, lo:lo + acc_w].astype(jnp.float32)
        if ragged:
            lane = jax.lax.broadcasted_iota(jnp.int32, chunk.shape, 1)
            valid = (base + lo + lane) < spatial_size
            psum = psum + jnp.where(valid, chunk, 0.0)
            pmax = jnp.maximum(pmax, jnp.where(valid, chunk, -jnp.inf))
        else:
            psum = psum + chunk
            pmax = jnp.maximum(pmax, chunk)
    sum_acc[...] = psum
    max_acc[...] = pmax

    @pl.when(s_id == pl.num_programs(2) - 1)
    def _finalize():
        avg = jnp.sum(sum_acc[...], axis=1, keepdims=True) * inv_hw   # (block_c, 1)
        mx = jnp.max(max_acc[...], axis=1, keepdims=True)             # (block_c, 1)
        o_ref[:, 0:1] = avg.astype(o_ref.dtype)
        o_ref[:, 1:2] = mx.astype(o_ref.dtype)


# ------------------------------- MLP kernel -----------------------------------

def _mlp_kernel(avg_ref, max_ref, w1_ref, w2_ref, o_ref):
    # avg_ref/max_ref: (N, C); w1_ref: (C, Cr); w2_ref: (Cr, C); o_ref: (N, C)
    w1 = w1_ref[...].astype(jnp.float32)
    w2 = w2_ref[...].astype(jnp.float32)

    def mlp(v):
        h = jnp.maximum(jnp.dot(v, w1, preferred_element_type=jnp.float32), 0.0)
        return jnp.dot(h, w2, preferred_element_type=jnp.float32)

    logits = mlp(avg_ref[...].astype(jnp.float32)) + mlp(max_ref[...].astype(jnp.float32))
    o_ref[...] = (1.0 / (1.0 + jnp.exp(-logits))).astype(o_ref.dtype)


# ------------------------------ tile selection --------------------------------

def _choose_tiles(C, S, itemsize, target_block_bytes):
    # Channel (sublane) tile: multiple of 8 dividing C, capped at 64 so the
    # vreg-resident per-tile accumulators stay small; full C when C is small or
    # not 8-divisible (full-extent blocks are always layout-legal).
    if C <= 64 or C % 8 != 0:
        block_c = C   # TODO(synk): very large non-8-divisible C falls back to one channel block
    else:
        block_c = 64
        while C % block_c != 0:
            block_c -= 8
    # Spatial (lane) tile: multiple of 128, sized so one block is ~target bytes
    # (double-buffered input then fits every chip's scoped VMEM), capped at
    # 64 chunks of 128 lanes to bound in-kernel unrolling.
    if S <= _LANE:
        block_s = S
    else:
        budget = max(_LANE, target_block_bytes // (block_c * itemsize))
        block_s = min(budget, 64 * _LANE, S)
        block_s = (block_s // _LANE) * _LANE
    return block_c, block_s


# ----------------------------- pallas_call wrapper -----------------------------

def channel_attention(x_nchw, w1, w2, *, target_block_bytes=4 * 1024 * 1024):
    """ChannelAttention forward. x_nchw: (N, C, H, W); w1: (C, Cr); w2: (Cr, C).

    w1/w2 are the PyTorch 1x1-conv weights stored as matmul matrices
    (f1.weight[:, :, 0, 0].T and f2.weight[:, :, 0, 0].T respectively).
    Returns sigmoid attention weights of shape (N, C, 1, 1).
    """
    N, C, H, W = x_nchw.shape
    S = H * W
    itemsize = x_nchw.dtype.itemsize
    block_c, block_s = _choose_tiles(C, S, itemsize, target_block_bytes)
    acc_w = min(block_s, _LANE)

    # Free layout change: NCHW is already contiguous as (N, C, H*W).
    x3 = x_nchw.reshape(N, C, S)

    pool_kernel = functools.partial(_pool_kernel, spatial_size=S,
                                    inv_hw=1.0 / float(S))

    block_bytes = block_c * block_s * itemsize
    vmem_limit = int(min(32 * 1024 * 1024, max(16 * 1024 * 1024, 4 * block_bytes)))

    pooled = pl.pallas_call(
        pool_kernel,
        out_shape=jax.ShapeDtypeStruct((N, C, 2), jnp.float32),
        grid_spec=pltpu.PrefetchScalarGridSpec(
            num_scalar_prefetch=0,
            grid=(N, C // block_c, pl.cdiv(S, block_s)),   # reduction axis last
            in_specs=[
                pl.BlockSpec((None, block_c, block_s), lambda n, c, s: (n, c, s)),
            ],
            out_specs=pl.BlockSpec((None, block_c, 2), lambda n, c, s: (n, c, 0)),
            scratch_shapes=[
                pltpu.VMEM((block_c, acc_w), jnp.float32),   # running sum
                pltpu.VMEM((block_c, acc_w), jnp.float32),   # running max
            ],
        ),
        compiler_params=pltpu.CompilerParams(
            dimension_semantics=("parallel", "parallel", "arbitrary"),
            vmem_limit_bytes=vmem_limit,
        ),
        cost_estimate=pl.CostEstimate(
            flops=int(2 * N * C * S),
            transcendentals=0,
            bytes_accessed=int(x3.size * itemsize + N * C * 2 * 4),
        ),
    )(x3)

    avg = pooled[:, :, 0]   # (N, C) f32
    mx = pooled[:, :, 1]    # (N, C) f32

    Cr = w1.shape[1]
    att = pl.pallas_call(
        _mlp_kernel,
        out_shape=jax.ShapeDtypeStruct((N, C), x_nchw.dtype),
        cost_estimate=pl.CostEstimate(
            flops=int(2 * N * 2 * (2 * C * Cr)),
            transcendentals=int(N * C),
            bytes_accessed=int((2 * N * C + w1.size + w2.size + N * C) * 4),
        ),
    )(avg, mx, w1, w2)

    return att.reshape(N, C, 1, 1)


# ----------------------------- plain-JAX reference -----------------------------

def ref_channel_attention(x, w1, w2):
    N, C, H, W = x.shape
    avg = jnp.mean(x.astype(jnp.float32), axis=(2, 3))   # (N, C)
    mx = jnp.max(x.astype(jnp.float32), axis=(2, 3))     # (N, C)

    def mlp(v):
        return jnp.maximum(v @ w1, 0.0) @ w2

    out = jax.nn.sigmoid(mlp(avg) + mlp(mx)).astype(x.dtype)
    return out.reshape(N, C, 1, 1)


# ------------------------------------ main -------------------------------------

if __name__ == "__main__":
    key = jax.random.PRNGKey(0)

    # Test 1: standard shape (C multiple of 8, S multiple of 128, N > 1).
    N, C, H, W = 2, 64, 16, 16
    ratio = 16
    Cr = C // ratio
    kx, k1, k2, key = jax.random.split(key, 4)
    x = jax.random.normal(kx, (N, C, H, W), jnp.float32)
    w1 = 0.2 * jax.random.normal(k1, (C, Cr), jnp.float32)
    w2 = 0.2 * jax.random.normal(k2, (Cr, C), jnp.float32)

    out = jax.block_until_ready(channel_attention(x, w1, w2))
    ref = jax.block_until_ready(ref_channel_attention(x, w1, w2))
    assert out.shape == (N, C, 1, 1), out.shape
    np.testing.assert_allclose(np.asarray(out), np.asarray(ref),
                               rtol=1e-5, atol=1e-5)

    # Test 2: ragged spatial tile + non-8-divisible channels + N == 1.
    N2, C2, H2, W2 = 1, 48, 13, 13
    Cr2 = C2 // 16
    kx2, k12, k22, key = jax.random.split(key, 4)
    x2 = jax.random.normal(kx2, (N2, C2, H2, W2), jnp.float32)
    w12 = 0.2 * jax.random.normal(k12, (C2, Cr2), jnp.float32)
    w22 = 0.2 * jax.random.normal(k22, (Cr2, C2), jnp.float32)

    out2 = jax.block_until_ready(channel_attention(x2, w12, w22))
    ref2 = jax.block_until_ready(ref_channel_attention(x2, w12, w22))
    assert out2.shape == (N2, C2, 1, 1), out2.shape
    np.testing.assert_allclose(np.asarray(out2), np.asarray(ref2),
                               rtol=1e-5, atol=1e-5)

    print("KERNEL_OK")
</pallas_src>

<mosaic_0001>
module attributes {stable_mosaic.version = 11 : i64} {
  func.func @_pool_kernel(%arg0: i32, %arg1: i32, %arg2: i32, %arg3: memref<1x64x256xf32, #tpu.memory_space<vmem>>, %arg4: memref<1x64x2xf32, #tpu.memory_space<vmem>>, %arg5: memref<64x128xf32, #tpu.memory_space<vmem>>, %arg6: memref<64x128xf32, #tpu.memory_space<vmem>>) attributes {dimension_semantics = [#tpu.dimension_semantics<parallel>, #tpu.dimension_semantics<parallel>, #tpu.dimension_semantics<arbitrary>], iteration_bounds = array<i64: 2, 1, 1>, scalar_prefetch = 0 : i64, scratch_operands = 2 : i64, tpu.core_type = #tpu.core_type<tc>, window_params = [{transform_indices = @transform_0, window_bounds = array<i64: 1, 64, 256>}, {transform_indices = @transform_1, window_bounds = array<i64: 1, 64, 2>}]} {
    %c0_i32 = arith.constant 0 : i32
    %0 = arith.cmpi eq, %arg2, %c0_i32 : i32
    %1 = arith.extui %0 : i1 to i32
    %c0_i32_0 = arith.constant 0 : i32
    %2 = arith.cmpi ne, %1, %c0_i32_0 : i32
    scf.if %2 {
      %cst = arith.constant 0.000000e+00 : f32
      %18 = vector.broadcast %cst : f32 to vector<64x128xf32>
      %c0_15 = arith.constant 0 : index
      %c0_16 = arith.constant 0 : index
      %19 = vector.load %arg5[%c0_15, %c0_16] : memref<64x128xf32, #tpu.memory_space<vmem>>, vector<64x128xf32>
      tpu.vector_store %arg5[%c0_15, %c0_16], %18 {strides = array<i32>} : memref<64x128xf32, #tpu.memory_space<vmem>>, vector<64x128xf32>,
      %cst_17 = arith.constant 0xFF800000 : f32
      %20 = vector.broadcast %cst_17 : f32 to vector<64x128xf32>
      %c0_18 = arith.constant 0 : index
      %c0_19 = arith.constant 0 : index
      %21 = vector.load %arg6[%c0_18, %c0_19] : memref<64x128xf32, #tpu.memory_space<vmem>>, vector<64x128xf32>
      tpu.vector_store %arg6[%c0_18, %c0_19], %20 {strides = array<i32>} : memref<64x128xf32, #tpu.memory_space<vmem>>, vector<64x128xf32>,
    } else {
    }
    %c0 = arith.constant 0 : index
    %c0_1 = arith.constant 0 : index
    %3 = vector.load %arg5[%c0, %c0_1] : memref<64x128xf32, #tpu.memory_space<vmem>>, vector<64x128xf32>
    %c0_2 = arith.constant 0 : index
    %c0_3 = arith.constant 0 : index
    %4 = vector.load %arg6[%c0_2, %c0_3] : memref<64x128xf32, #tpu.memory_space<vmem>>, vector<64x128xf32>
    %c0_4 = arith.constant 0 : index
    %c0_5 = arith.constant 0 : index
    %c0_6 = arith.constant 0 : index
    %5 = vector.load %arg3[%c0_4, %c0_5, %c0_6] : memref<1x64x256xf32, #tpu.memory_space<vmem>>, vector<1x64x128xf32>
    %6 = vector.shape_cast %5 : vector<1x64x128xf32> to vector<64x128xf32>
    %7 = arith.addf %3, %6 : vector<64x128xf32>
    %8 = arith.maximumf %4, %6 : vector<64x128xf32>
    %c0_7 = arith.constant 0 : index
    %c0_8 = arith.constant 0 : index
    %c128 = arith.constant 128 : index
    %9 = vector.load %arg3[%c0_7, %c0_8, %c128] : memref<1x64x256xf32, #tpu.memory_space<vmem>>, vector<1x64x128xf32>
    %10 = vector.shape_cast %9 : vector<1x64x128xf32> to vector<64x128xf32>
    %11 = arith.addf %7, %10 : vector<64x128xf32>
    %12 = arith.maximumf %8, %10 : vector<64x128xf32>
    %c0_9 = arith.constant 0 : index
    %c0_10 = arith.constant 0 : index
    %13 = vector.load %arg5[%c0_9, %c0_10] : memref<64x128xf32, #tpu.memory_space<vmem>>, vector<64x128xf32>
    tpu.vector_store %arg5[%c0_9, %c0_10], %11 {strides = array<i32>} : memref<64x128xf32, #tpu.memory_space<vmem>>, vector<64x128xf32>,
    %c0_11 = arith.constant 0 : index
    %c0_12 = arith.constant 0 : index
    %14 = vector.load %arg6[%c0_11, %c0_12] : memref<64x128xf32, #tpu.memory_space<vmem>>, vector<64x128xf32>
    tpu.vector_store %arg6[%c0_11, %c0_12], %12 {strides = array<i32>} : memref<64x128xf32, #tpu.memory_space<vmem>>, vector<64x128xf32>,
    %c0_i32_13 = arith.constant 0 : i32
    %15 = arith.cmpi eq, %arg2, %c0_i32_13 : i32
    %16 = arith.extui %15 : i1 to i32
    %c0_i32_14 = arith.constant 0 : i32
    %17 = arith.cmpi ne, %16, %c0_i32_14 : i32
    scf.if %17 {
      %c0_15 = arith.constant 0 : index
      %c0_16 = arith.constant 0 : index
      %18 = vector.load %arg5[%c0_15, %c0_16] : memref<64x128xf32, #tpu.memory_space<vmem>>, vector<64x128xf32>
      %cst = arith.constant dense<0.000000e+00> : vector<64xf32>
      %19 = vector.multi_reduction <add>, %18, %cst [1] : vector<64x128xf32> to vector<64xf32>
      %20 = vector.shape_cast %19 : vector<64xf32> to vector<64x1xf32>
      %cst_17 = arith.constant 3.906250e-03 : f32
      %21 = vector.broadcast %cst_17 : f32 to vector<64x1xf32>
      %22 = arith.mulf %20, %21 : vector<64x1xf32>
      %c0_18 = arith.constant 0 : index
      %c0_19 = arith.constant 0 : index
      %23 = vector.load %arg6[%c0_18, %c0_19] : memref<64x128xf32, #tpu.memory_space<vmem>>, vector<64x128xf32>
      %cst_20 = arith.constant dense<0xFF800000> : vector<64xf32>
      %24 = vector.multi_reduction <maximumf>, %23, %cst_20 [1] : vector<64x128xf32> to vector<64xf32>
      %25 = vector.shape_cast %24 : vector<64xf32> to vector<64x1xf32>
      %c0_21 = arith.constant 0 : index
      %c0_22 = arith.constant 0 : index
      %c0_23 = arith.constant 0 : index
      %26 = vector.load %arg4[%c0_21, %c0_22, %c0_23] : memref<1x64x2xf32, #tpu.memory_space<vmem>>, vector<1x64x1xf32>
      %27 = vector.shape_cast %26 : vector<1x64x1xf32> to vector<64x1xf32>
      %28 = vector.shape_cast %22 : vector<64x1xf32> to vector<1x64x1xf32>
      tpu.vector_store %arg4[%c0_21, %c0_22, %c0_23], %28 {strides = array<i32>} : memref<1x64x2xf32, #tpu.memory_space<vmem>>, vector<1x64x1xf32>,
      %c0_24 = arith.constant 0 : index
      %c0_25 = arith.constant 0 : index
      %c1 = arith.constant 1 : index
      %29 = vector.load %arg4[%c0_24, %c0_25, %c1] : memref<1x64x2xf32, #tpu.memory_space<vmem>>, vector<1x64x1xf32>
      %30 = vector.shape_cast %29 : vector<1x64x1xf32> to vector<64x1xf32>
      %31 = vector.shape_cast %25 : vector<64x1xf32> to vector<1x64x1xf32>
      tpu.vector_store %arg4[%c0_24, %c0_25, %c1], %31 {strides = array<i32>} : memref<1x64x2xf32, #tpu.memory_space<vmem>>, vector<1x64x1xf32>,
    } else {
    }
    return
  }
  func.func @transform_0(%arg0: i32, %arg1: i32, %arg2: i32) -> (i32, i32, i32) {
    %c0_i32 = arith.constant 0 : i32
    return %arg0, %arg1, %arg2 : i32, i32, i32
  }
  func.func @transform_1(%arg0: i32, %arg1: i32, %arg2: i32) -> (i32, i32, i32) {
    %c0_i32 = arith.constant 0 : i32
    %c0_i32_0 = arith.constant 0 : i32
    return %arg0, %arg1, %c0_i32 : i32, i32, i32
  }
}

</mosaic_0001>

<bundles_post_ra>
// kernel: tpu_custom_call.1
= control target key start
LH: loop header
LB: loop body
LE: loop exit
PB: predicated region body
PF: predicated region fallthrough
CT: control target
= control target key end

     0   :  { %6 = vsyncpa [#allocation5], 0  ;;  %s780_s0 = inlined_call_operand.hbm [shape: f32[2,64,256], index: 0, kind: input, shape index: {}]   ;;  %s781_s1 = inlined_call_operand.vmem [shape: f32[2,64,2], index: 1, kind: output, shape index: {}]  }
   0x1   :  { %8 = vsyncpa [#allocation5 + $0x1], 0  ;;  %s622_s6 = smov 0   ;;  %s624_s7 = smov 0  }
   0x2   :  { %s626_s8 = smov 0   ;;  %s628_s9 = smov 0  }
   0x3   :  { %s630_s10 = smov 0   ;;  %s632_s11 = smov 0  }
   0x4 LB: > { %s455_s12 = sadd.s32 4294967295, %s607_s11   ;;  %s33_s13 = sadd.s32 1, %s603_s10  ;;  %s607_s11 = sphi %s632_s11, %s14_s11   ;;  %s603_s10 = sphi %s630_s10, %s789_s10   ;;  %s599_s9 = sphi %s628_s9, %s788_s9   ;;  %s595_s8 = sphi %s626_s8, %s787_s8   ;;  %s591_s7 = sphi %s624_s7, %s786_s7   ;;  %s587_s6 = sphi %s622_s6, %s785_s6  }
   0x5   : > { %p35_p0 = scmp.ge.s32.totalorder %s33_s13, 2  ;;  %s44_s14 = sadd.s32 1, %s595_s8 }
   0x6   : > { %p51_p1 = scmp.ne.s32.totalorder %s595_s8, %s591_s7  ;;  %p52_p2 = scmp.eq.s32.totalorder %s607_s11, 0 }
   0x7   : > { %s791_s13 = smov (%p35_p0, %s33_s13), 0  ;;  %p57_p4 = scmp.ne.s32.totalorder %s591_s7, %s587_s6 }
   0x8   : > { %p658_p3 = por %p52_p2, %p51_p1  ;;  %s37_s16 = ssub.s32 %s603_s10, %s791_s13 }
   0x9   : > { %p58_p5 = scmp.eq.s32.totalorder %s455_s12, 0  ;;  %p42_p6 = scmp.eq.s32.totalorder %s37_s16, 0 }
   0xa   : > { %p476_p8 = scmp.lt.s32.totalorder %s607_s11, 2  ;;  %s109_s19 = sand.u32 1, %s595_s8  }
   0xb   : > { %p665_p7 = por %p58_p5, %p57_p4  ;;  %s468_s20 = sshll.u32 %s603_s10, 11 }
   0xc   : > { %s671_s18 = scalar_select %p42_p6, %s595_s8, %s44_s14  }
   0xd   : > { %s459_s21 = sshll.u32 %s109_s19, 7  ;;  %s678_s24 = scalar_lea.hbm %s780_s0, %s468_s20 }
   0xe   : > { %s113_s25 = scalar_lea.vmem [#allocation4], %s459_s21  ;;  %p682_p9 = pnand %p476_p8, %p658_p3 }
   0xf   : > { %s125_s26 = sshll.u32 %s113_s25, 4  ;;  %s688_s28 = scalar_lea.sflag [#allocation5], %s109_s19  ;;  %s686_s26 = int_to_ptr.vmem [resolvable:$true] %s125_s26 }
  0x10   : > { %s527_s29 = scalar_lea.hbm %s678_s24, 2048  ;;  %p529_p11 = pneg %p682_p9 }
  0x11   : > { %p528_p10 = scmp.ne.s32.totalorder %s678_s24, %s527_s29  ;;  %s532_s3 = scalar_lea.hbm %s780_s0, 4096 }
  0x12   : > { %p533_p0 = scmp.lt.u32.totalorder %s678_s24, %s780_s0  ;;  %p534_p1 = scmp.lt.u32.totalorder %s532_s3, %s527_s29 }
  0x13   : > { %p530_p12 = pnand %p529_p11, %p528_p10  ;;  %p536_p3 = scmp.lt.u32.totalorder %s527_s29, %s678_s24 }
  0x14   : > { %p535_p2 = por %p534_p1, %p533_p0 }
  0x15   : > { %p531_p13 = pneg %p530_p12 }
  0x16   : > { %p537_p4 = por %p536_p3, %p535_p2 }
  0x18   : > { %p538_p5 = pnand %p537_p4, %p531_p13 }
  0x1a   : > { %541 = shalt.err (!%p538_p5)
}
  0x1b   : > { %s542_s6 = scalar_lea.vmem %s686_s26, 2048  ;;  %s609_s12 = smov [#allocation4]  }
  0x1c   : > { %p543_p6 = scmp.ne.s32.totalorder %s686_s26, %s542_s6  ;;  %s547_s14 = sshll.u32 %s609_s12, 4  ;;  %s548_s14 = int_to_ptr.vmem [resolvable:$false] %s547_s14 }
  0x1d   : > { %s549_s15 = scalar_lea.vmem %s548_s14, 4096  ;;  %p550_p12 = scmp.lt.s32.totalorder %s686_s26, %s548_s14 }
  0x1e   : > { %p545_p8 = pnand %p543_p6, %p529_p11  ;;  %p551_p0 = scmp.lt.s32.totalorder %s549_s15, %s542_s6 }
  0x20   : > { %p546_p10 = pneg %p545_p8  ;;  %p552_p1 = por %p551_p0, %p550_p12 }
  0x22   : > { %p553_p2 = pnand %p552_p1, %p546_p10 }
  0x24   : > { %556 = shalt.err (!%p553_p2)
}
  0x25   : > { %s610_s16 = smov 256   ;;  %s611_s19 = smov 16  }
  0x26   : > { %475 = dma.hbm_to_vmem [thread:$0]  (!%p682_p9), %s678_s24, 2048, %s686_s26, %s688_s28, %s610_s16, %s610_s16, %s611_s19  }
  0x27   : > { %p462_p11 = scmp.ge.s32.totalorder %s607_s11, 1  ;;  %p133_p13 = scmp.lt.s32.totalorder %s607_s11, 3 }
  0x29   : > { %p134_p3 = pnand %p462_p11, %p133_p13 }
  0x2a   : > { %s139_s20 = sand.u32 (!%p134_p3), 1, %s591_s7  }
  0x2b   : > { %137 = sbr.rel (%p134_p3) target bundleno = 226 (0xe2), region = 24  ;;  %s463_s21 = sshll.u32 (!%p134_p3), %s139_s20, 7 }
  0x2c   : > { %s140_s22 = scalar_lea.sflag (!%p134_p3), [#allocation5], %s139_s20  ;;  %s143_s23 = scalar_lea.vmem (!%p134_p3), [#allocation4], %s463_s21 }
  0x32   : > { %582 = dma.done.wait (%p665_p7), %s140_s22, 2048  }
  0x33   : > { %584 = vsyncadd (%p665_p7), %s140_s22, 4294965248  ;;  %v216_v0 = vld [vmem:[%s143_s23 + $0x20] sm:$0xff]  ;;  %v240_v1 = vld [vmem:[%s143_s23 + $0x28] sm:$0xff]  ;;  %p169_p7 = scmp.lt.s32.totalorder %s599_s9, 1  ;;  %vm337_vm0 = vcmask 7168   ;;  %vm346_vm1 = vcmask 15368  }
  0x34   : > { %v214_v2 = vld [vmem:[%s143_s23] sm:$0xff]  ;;  %v248_v3 = vadd.f32 %v240_v1, %v216_v0  ;;  %v238_v4 = vld [vmem:[%s143_s23 + $0x8] sm:$0xff]  ;;  %v217_v5 = vld [vmem:[%s143_s23 + $0x30] sm:$0xff]  ;;  %v256_v27 = vmax.f32 %v216_v0, %v240_v1 }
  0x35   : > { %v241_v6 = vld [vmem:[%s143_s23 + $0x38] sm:$0xff]  ;;  %v246_v7 = vadd.f32 %v238_v4, %v214_v2  ;;  %v215_v8 = vld [vmem:[%s143_s23 + $0x10] sm:$0xff]  ;;  %v218_v14 = vld [vmem:[%s143_s23 + $0x40] sm:$0xff]  ;;  %v254_v25 = vmax.f32 %v214_v2, %v238_v4  ;;  %s793_s9 = smov (!%p169_p7, %s599_s9), 1 }
  0x36   : > { %v239_v9 = vld [vmem:[%s143_s23 + $0x18] sm:$0xff]  ;;  %293 = vadd.xlane.f32.xlu1 %v248_v3  ;;  %v249_v10 = vadd.f32 %v241_v6, %v217_v5  ;;  %v219_v12 = vld [vmem:[%s143_s23 + $0x50] sm:$0xff]  ;;  %v242_v15 = vld [vmem:[%s143_s23 + $0x48] sm:$0xff]  ;;  %v257_v26 = vmax.f32 %v217_v5, %v241_v6  ;;  %s469_s17 = sshll.u32 %s793_s9, 6 }
  0x37   : > { %289 = vadd.xlane.f32.xlu0 %v246_v7  ;;  %v247_v11 = vadd.f32 %v239_v9, %v215_v8  ;;  %v243_v13 = vld [vmem:[%s143_s23 + $0x58] sm:$0xff]  ;;  %v250_v17 = vadd.f32 %v242_v15, %v218_v14  ;;  %v221_v18 = vld [vmem:[%s143_s23 + $0x70] sm:$0xff]  ;;  %v220_v20 = vld [vmem:[%s143_s23 + $0x60] sm:$0xff]  ;;  %v255_v24 = vmax.f32 %v215_v8, %v239_v9  ;;  %v258_v29 = vmax.f32 %v218_v14, %v242_v15  ;;  %s728_s26 = scalar_lea.vmem %s781_s1, %s469_s17 }
  0x38   : > { %v251_v16 = vadd.f32 %v243_v13, %v219_v12  ;;  %v245_v19 = vld [vmem:[%s143_s23 + $0x78] sm:$0xff]  ;;  %v244_v21 = vld [vmem:[%s143_s23 + $0x68] sm:$0xff]  ;;  %v259_v28 = vmax.f32 %v219_v12, %v243_v13 }
  0x39   : > { %v253_v22 = vadd.f32 %v245_v19, %v221_v18  ;;  %v252_v23 = vadd.f32 %v244_v21, %v220_v20  ;;  %v261_v30 = vmax.f32 %v221_v18, %v245_v19  ;;  %v260_v31 = vmax.f32 %v220_v20, %v244_v21 }
  0x3a   : > { %295 = vadd.xlane.f32.xlu1 %v249_v10 }
  0x3b   : > { %291 = vadd.xlane.f32.xlu0 %v247_v11 }
  0x3e   : > { %299 = vadd.xlane.f32.xlu1 %v251_v16 }
  0x3f   : > { %297 = vadd.xlane.f32.xlu0 %v250_v17 }
  0x42   : > { %303 = vadd.xlane.f32.xlu1 %v253_v22 }
  0x43   : > { %301 = vadd.xlane.f32.xlu0 %v252_v23 }
  0x46   : > { %323 = vmax.xlane.f32.xlu1 %v255_v24 }
  0x47   : > { %321 = vmax.xlane.f32.xlu0 %v254_v25 }
  0x4a   : > { %327 = vmax.xlane.f32.xlu1 %v257_v26 }
  0x4b   : > { %325 = vmax.xlane.f32.xlu0 %v256_v27 }
  0x4e   : > { %331 = vmax.xlane.f32.xlu1 %v259_v28 }
  0x4f   : > { %329 = vmax.xlane.f32.xlu0 %v258_v29 }
  0x52   : > { %335 = vmax.xlane.f32.xlu1 %v261_v30 }
  0x53   : > { %333 = vmax.xlane.f32.xlu0 %v260_v31 }
  0xc3   : > { %v294_v32 = vpop.xlane.xlu1 %293 }
  0xc4   : > { %v307_v33 = vmul.f32 0.00390625, %v294_v32  ;;  %v290_v34 = vpop.xlane.xlu0 %289 }
  0xc5   : > { %v305_v35 = vmul.f32 0.00390625, %v290_v34 }
  0xc6   : > { %340 = vst.msk [vmem:[%s728_s26 + $0x10] sm:$0xff] %vm337_vm0, %v307_v33 }
  0xc7   : > { %338 = vst.msk [vmem:[%s728_s26] sm:$0xff] %vm337_vm0, %v305_v35  ;;  %v296_v36 = vpop.xlane.xlu1 %295 }
  0xc8   : > { %v308_v37 = vmul.f32 0.00390625, %v296_v36  ;;  %v292_v38 = vpop.xlane.xlu0 %291 }
  0xc9   : > { %v306_v39 = vmul.f32 0.00390625, %v292_v38 }
  0xca   : > { %341 = vst.msk [vmem:[%s728_s26 + $0x18] sm:$0xff] %vm337_vm0, %v308_v37 }
  0xcb   : > { %339 = vst.msk [vmem:[%s728_s26 + $0x8] sm:$0xff] %vm337_vm0, %v306_v39  ;;  %v300_v40 = vpop.xlane.xlu1 %299 }
  0xcc   : > { %v310_v41 = vmul.f32 0.00390625, %v300_v40  ;;  %v298_v42 = vpop.xlane.xlu0 %297 }
  0xcd   : > { %v309_v43 = vmul.f32 0.00390625, %v298_v42 }
  0xce   : > { %343 = vst.msk [vmem:[%s728_s26 + $0x28] sm:$0xff] %vm337_vm0, %v310_v41 }
  0xcf   : > { %342 = vst.msk [vmem:[%s728_s26 + $0x20] sm:$0xff] %vm337_vm0, %v309_v43  ;;  %v304_v44 = vpop.xlane.xlu1 %303 }
  0xd0   : > { %v312_v45 = vmul.f32 0.00390625, %v304_v44  ;;  %v302_v46 = vpop.xlane.xlu0 %301 }
  0xd1   : > { %v311_v47 = vmul.f32 0.00390625, %v302_v46 }
  0xd2   : > { %345 = vst.msk [vmem:[%s728_s26 + $0x38] sm:$0xff] %vm337_vm0, %v312_v45 }
  0xd3   : > { %344 = vst.msk [vmem:[%s728_s26 + $0x30] sm:$0xff] %vm337_vm0, %v311_v47  ;;  %v324_v48 = vpop.xlane.xlu1 %323 }
  0xd4   : > { %348 = vst.msk [vmem:[%s728_s26 + $0x8] sm:$0xff] %vm346_vm1, %v324_v48  ;;  %v322_v49 = vpop.xlane.xlu0 %321 }
  0xd5   : > { %347 = vst.msk [vmem:[%s728_s26] sm:$0xff] %vm346_vm1, %v322_v49 }
  0xd7   : > { %v328_v50 = vpop.xlane.xlu1 %327 }
  0xd8   : > { %350 = vst.msk [vmem:[%s728_s26 + $0x18] sm:$0xff] %vm346_vm1, %v328_v50  ;;  %v326_v51 = vpop.xlane.xlu0 %325 }
  0xd9   : > { %349 = vst.msk [vmem:[%s728_s26 + $0x10] sm:$0xff] %vm346_vm1, %v326_v51 }
  0xdb   : > { %v332_v52 = vpop.xlane.xlu1 %331 }
  0xdc   : > { %352 = vst.msk [vmem:[%s728_s26 + $0x28] sm:$0xff] %vm346_vm1, %v332_v52  ;;  %v330_v53 = vpop.xlane.xlu0 %329 }
  0xdd   : > { %351 = vst.msk [vmem:[%s728_s26 + $0x20] sm:$0xff] %vm346_vm1, %v330_v53 }
  0xdf   : > { %v336_v54 = vpop.xlane.xlu1 %335 }
  0xe0   : > { %354 = vst.msk [vmem:[%s728_s26 + $0x38] sm:$0xff] %vm346_vm1, %v336_v54  ;;  %v334_v55 = vpop.xlane.xlu0 %333 }
  0xe1   : > { %353 = vst.msk [vmem:[%s728_s26 + $0x30] sm:$0xff] %vm346_vm1, %v334_v55 }
  0xe2 PF: > { %s14_s11 = sadd.s32 1, %s607_s11   ;;  %s785_s6 = smov %s591_s7 }
  0xe3   : > { %p11_p9 = scmp.ge.s32.totalorder %s14_s11, 4   ;;  %s786_s7 = smov %s595_s8 }
  0xe4   : > { %s787_s8 = smov %s671_s18  ;;  %s788_s9 = smov %s603_s10 }
  0xe5   : > { %s789_s10 = smov %s791_s13  ;;  %13 = sbr.rel (!%p11_p9) target bundleno = 4 (0x4), region = 72 }
  0xec   :  { %385 = vsyncpa [#allocation5], 1 }
  0xed   :  { %387 = vsyncpa [#allocation5 + $0x1], 1 }

</bundles_post_ra>
